<compile_context>
chip_gen: v7x
topology: tpu7x:2x2x1
jax: 0.10.0
libtpu: 0.0.40
codegen_flags: <defaults>
</compile_context>

<pallas_src>
import functools

import jax
import jax.numpy as jnp
import numpy as np
from jax.experimental import pallas as pl
from jax.experimental.pallas import tpu as pltpu


def _round_up(v, m):
    return ((v + m - 1) // m) * m


# ----------------------------------------------------------------------------
# Fused single-stage kernel
# ----------------------------------------------------------------------------
def _fused_stage_kernel(
    dilations,          # static: tuple of python ints (one per residual layer)
    pad,                # static: left/right halo width in the activation scratch
    t_len,              # static: T
    apply_softmax_in,   # static: fuse softmax(x, axis=channel) * mask on input
    approx_recip,       # static: use approx (EUP) reciprocal in the softmax
    compute_dtype,      # static: dtype of the MXU activation operands
    # --- refs ---
    x_ref,              # (1, kb, T)   input block (Cin tile)
    m_ref,              # (1, 1, T)    mask row
    in_w_ref,           # (C, kb)      stage-entry conv weight tile (compute_dtype)
    in_b_ref,           # (C, 1)       f32
    wdm_ref,            # (L, C, C)    dilated tap @ t-d
    wdc_ref,            # (L, C, C)    dilated tap @ t
    wdp_ref,            # (L, C, C)    dilated tap @ t+d
    bd_ref,             # (L, C, 1)    f32
    w1_ref,             # (L, C, C)    per-layer 1x1 conv
    b1_ref,             # (L, C, 1)    f32
    out_w_ref,          # (Ccls, C)
    out_b_ref,          # (Ccls, 1)    f32
    o_ref,              # (1, Ccls, T)
    act_ref,            # VMEM scratch (C, T + 2*pad) f32, zero halo
):
    k = pl.program_id(1)
    nk = pl.num_programs(1)
    cd = compute_dtype
    lo, hi = pad, pad + t_len
    C = act_ref.shape[0]

    xin = x_ref[0]  # (kb, T)
    if apply_softmax_in:
        # softmax over the class axis (full axis in one block), then mask.
        xf = xin.astype(jnp.float32)
        xmx = jnp.max(xf, axis=0, keepdims=True)
        e = jnp.exp(xf - xmx)
        inv = pl.reciprocal(jnp.sum(e, axis=0, keepdims=True), approx=approx_recip)
        xin = e * inv * m_ref[0]
    xin = xin.astype(cd)

    # Stage-entry 1x1 conv for this Cin tile (single matmul, f32 accumulation).
    y0 = jnp.dot(in_w_ref[...], xin, preferred_element_type=jnp.float32)

    @pl.when(k == 0)
    def _init_write():
        # Zero only the halo columns (they are never overwritten afterwards:
        # every later store targets [:, lo:hi]) and write -- not RMW -- the
        # first partial sum.  Done per batch element so each megacore shard
        # starts from a clean halo.
        halo = jnp.zeros((C, pad), jnp.float32)
        act_ref[:, :pad] = halo
        act_ref[:, hi:] = halo
        act_ref[:, lo:hi] = y0

    @pl.when(k > 0)
    def _accumulate():
        act_ref[:, lo:hi] = act_ref[:, lo:hi] + y0

    @pl.when(k == nk - 1)
    def _finalize():
        # add entry-conv bias once
        act_ref[:, lo:hi] = act_ref[:, lo:hi] + in_b_ref[...]

        # Dilated-residual layers, activation kept in VMEM.  Three accumulating
        # K=C matmuls read the shifted windows directly (no (3C,T) temp).
        for l, d in enumerate(dilations):
            x_cur = act_ref[:, lo:hi]                         # f32 (C, T)
            xm = act_ref[:, lo - d:hi - d].astype(cd)         # x[t - d] (zero pad)
            xc = x_cur.astype(cd)                             # x[t]
            xp = act_ref[:, lo + d:hi + d].astype(cd)         # x[t + d] (zero pad)
            h = (jnp.dot(wdm_ref[l], xm, preferred_element_type=jnp.float32)
                 + jnp.dot(wdc_ref[l], xc, preferred_element_type=jnp.float32)
                 + jnp.dot(wdp_ref[l], xp, preferred_element_type=jnp.float32)
                 + bd_ref[l])
            h = jnp.maximum(h, 0.0)                           # ReLU
            y = jnp.dot(w1_ref[l], h.astype(cd),
                        preferred_element_type=jnp.float32) + b1_ref[l]
            # dropout == identity (eval mode); residual add in f32.
            act_ref[:, lo:hi] = x_cur + y

        # Stage-exit 1x1 conv + mask, straight to the output block.
        out = jnp.dot(out_w_ref[...], act_ref[:, lo:hi].astype(cd),
                      preferred_element_type=jnp.float32) + out_b_ref[...]
        o_ref[0] = (out * m_ref[0]).astype(o_ref.dtype)


def fused_stage(x, mask0, p, *, apply_softmax_in, compute_dtype=jnp.bfloat16,
                out_dtype=jnp.float32, k_block=1024):
    """One SS_TCN stage: [softmax*mask] -> conv1x1 -> L residual layers
    -> conv_out * mask, as a single pallas_call."""
    N, Cin, T = x.shape
    C = p["in_w"].shape[0]
    Ccls = p["out_w"].shape[0]
    dilations = tuple(int(d) for d in p["dilations"])
    pad = _round_up(max(dilations), 128)        # lane-aligned halo
    Tp = T + 2 * pad
    cd_bytes = jnp.dtype(compute_dtype).itemsize

    # Pre-cast MXU weight operands once (host-side); biases stay f32.
    in_w = p["in_w"].astype(compute_dtype)
    wdm = p["wdm"].astype(compute_dtype)
    wdc = p["wdc"].astype(compute_dtype)
    wdp = p["wdp"].astype(compute_dtype)
    w1 = p["w1"].astype(compute_dtype)
    out_w = p["out_w"].astype(compute_dtype)
    in_b, bd, b1, out_b = p["in_b"], p["bd"], p["b1"], p["out_b"]

    # Stage-0 input can be fed in the compute dtype (halves the dominant HBM
    # read).  Stages with fused softmax keep their f32 inter-stage input.
    if not apply_softmax_in and x.dtype != jnp.dtype(compute_dtype):
        x = x.astype(compute_dtype)

    # ---- VMEM budget -> Cin tile size + scoped limit ----
    try:
        vmem_cap = int(pltpu.get_tpu_info().vmem_capacity_bytes)
    except Exception:  # fall back to the smallest (v7x) capacity
        vmem_cap = 64 * 1024 * 1024
    budget = (vmem_cap * 3) // 4
    x_item = jnp.dtype(x.dtype).itemsize
    per_kb = 2 * T * x_item + 2 * C * cd_bytes            # dbl-buffered x + in_w cols
    const_w_bytes = ((int(wdm.size) + int(wdc.size) + int(wdp.size)
                      + int(w1.size) + int(out_w.size)) * cd_bytes
                     + (int(in_b.size) + int(bd.size) + int(b1.size)
                        + int(out_b.size)) * 4)
    fixed = (C * Tp * 4                                    # activation scratch
             + 2 * const_w_bytes                           # dbl-buffered weights
             + 2 * Ccls * T * jnp.dtype(out_dtype).itemsize
             + 2 * T * jnp.dtype(mask0.dtype).itemsize)
    kb_budget = max(8, (((budget - fixed) // per_kb) // 8) * 8)
    k_block = max(8, (int(k_block) // 8) * 8)

    if apply_softmax_in:
        # softmax-in fusion needs the full class axis in one block
        kb, nk = Cin, 1
    else:
        kb = min(Cin, k_block, kb_budget)
        if kb >= Cin:
            kb, nk = Cin, 1
        else:
            # ragged Cin: zero-pad host-side so every tile is full (no silent
            # full-Cin fallback that could blow past VMEM).
            cin_pad = _round_up(Cin, kb)
            if cin_pad != Cin:
                x = jnp.pad(x, ((0, 0), (0, cin_pad - Cin), (0, 0)))
                in_w = jnp.pad(in_w, ((0, 0), (0, cin_pad - Cin)))
            nk = cin_pad // kb

    vmem_limit = int(min(budget,
                         max(32 * 1024 * 1024, (fixed + per_kb * kb) * 5 // 4)))

    approx_recip = jnp.dtype(compute_dtype) != jnp.dtype(jnp.float32)
    kernel = functools.partial(
        _fused_stage_kernel, dilations, pad, T, apply_softmax_in, approx_recip,
        compute_dtype)

    return pl.pallas_call(
        kernel,
        out_shape=jax.ShapeDtypeStruct((N, Ccls, T), out_dtype),
        grid=(N, nk),
        in_specs=[
            pl.BlockSpec((1, kb, T), lambda n, k: (n, k, 0)),      # x
            pl.BlockSpec((1, 1, T), lambda n, k: (n, 0, 0)),       # mask row
            pl.BlockSpec((C, kb), lambda n, k: (0, k)),            # in_w
            pl.BlockSpec((C, 1), lambda n, k: (0, 0)),             # in_b
            pl.BlockSpec(wdm.shape, lambda n, k: (0, 0, 0)),       # wdm (L,C,C)
            pl.BlockSpec(wdc.shape, lambda n, k: (0, 0, 0)),       # wdc (L,C,C)
            pl.BlockSpec(wdp.shape, lambda n, k: (0, 0, 0)),       # wdp (L,C,C)
            pl.BlockSpec(bd.shape, lambda n, k: (0, 0, 0)),        # bd  (L,C,1)
            pl.BlockSpec(w1.shape, lambda n, k: (0, 0, 0)),        # w1  (L,C,C)
            pl.BlockSpec(b1.shape, lambda n, k: (0, 0, 0)),        # b1  (L,C,1)
            pl.BlockSpec((Ccls, C), lambda n, k: (0, 0)),          # out_w
            pl.BlockSpec((Ccls, 1), lambda n, k: (0, 0)),          # out_b
        ],
        out_specs=pl.BlockSpec((1, Ccls, T), lambda n, k: (n, 0, 0)),
        scratch_shapes=[pltpu.VMEM((C, Tp), jnp.float32)],
        compiler_params=pltpu.CompilerParams(
            dimension_semantics=("parallel", "arbitrary"),
            vmem_limit_bytes=vmem_limit,
        ),
    )(x, mask0, in_w, in_b, wdm, wdc, wdp, bd, w1, b1, out_w, out_b)


# ----------------------------------------------------------------------------
# Model glue
# ----------------------------------------------------------------------------
def ms_tcn_forward(all_params, x, mask, compute_dtype=jnp.bfloat16):
    mask0 = mask[:, 0:1, :]
    out = fused_stage(x, mask0, all_params[0],
                      apply_softmax_in=False, compute_dtype=compute_dtype)
    outputs = [out]
    for sp in all_params[1:]:
        # softmax(prev_out) * mask is fused into this stage's kernel
        out = fused_stage(out, mask0, sp,
                          apply_softmax_in=True, compute_dtype=compute_dtype)
        outputs.append(out)
    return jnp.stack(outputs, axis=0)


# ----------------------------------------------------------------------------
# Pure-JAX reference (correctness check only)
# ----------------------------------------------------------------------------
def _ref_stage(p, x, mask0, apply_softmax_in):
    if apply_softmax_in:
        x = jax.nn.softmax(x, axis=1) * mask0
    out = jnp.einsum("oi,nit->not", p["in_w"], x) + p["in_b"][None]
    N, C, T = out.shape
    taps = (p["wdm"], p["wdc"], p["wdp"])
    for l, d in enumerate(p["dilations"]):
        xp = jnp.pad(out, ((0, 0), (0, 0), (d, d)))
        h = sum(jnp.einsum("oi,nit->not", taps[k][l], xp[:, :, k * d:k * d + T])
                for k in range(3))
        h = jax.nn.relu(h + p["bd"][l][None])
        out = out + jnp.einsum("oi,nit->not", p["w1"][l], h) + p["b1"][l][None]
    return (jnp.einsum("oi,nit->not", p["out_w"], out) + p["out_b"][None]) * mask0


def _ref_ms_tcn(all_params, x, mask):
    mask0 = mask[:, 0:1, :]
    out = _ref_stage(all_params[0], x, mask0, False)
    outputs = [out]
    for sp in all_params[1:]:
        out = _ref_stage(sp, out, mask0, True)
        outputs.append(out)
    return jnp.stack(outputs, axis=0)


# ----------------------------------------------------------------------------
# Deterministic parameter construction
# ----------------------------------------------------------------------------
def make_stage_params(key, num_layers, num_f_maps, dim, num_classes):
    def u(k, shape, scale=0.3):
        return jax.random.uniform(k, shape, jnp.float32, -scale, scale)

    keys = jax.random.split(key, 4 + 4 * num_layers)
    p = {
        "in_w": u(keys[0], (num_f_maps, dim)),
        "in_b": u(keys[1], (num_f_maps, 1)),
        "out_w": u(keys[2], (num_classes, num_f_maps)),
        "out_b": u(keys[3], (num_classes, 1)),
    }
    wdm, wdc, wdp, bd, w1, b1 = [], [], [], [], [], []
    for i in range(num_layers):
        k0, k1, k2, k3 = keys[4 + 4 * i: 8 + 4 * i]
        taps = u(k0, (3, num_f_maps, num_f_maps))   # (tap, out, in)
        wdm.append(taps[0]); wdc.append(taps[1]); wdp.append(taps[2])
        bd.append(u(k1, (num_f_maps, 1)))
        w1.append(u(k2, (num_f_maps, num_f_maps)))
        b1.append(u(k3, (num_f_maps, 1)))
    p["wdm"] = jnp.stack(wdm)      # (L, C, C)  tap @ t-d
    p["wdc"] = jnp.stack(wdc)      # (L, C, C)  tap @ t
    p["wdp"] = jnp.stack(wdp)      # (L, C, C)  tap @ t+d
    p["bd"] = jnp.stack(bd)        # (L, C, 1)
    p["w1"] = jnp.stack(w1)        # (L, C, C)
    p["b1"] = jnp.stack(b1)        # (L, C, 1)
    p["dilations"] = tuple(2 ** i for i in range(num_layers))
    return p


if __name__ == "__main__":
    # Small shapes consistent with the module: x is (N, dim, T), mask is (N, C_cls, T)
    num_stages, num_layers, num_f_maps, dim, num_classes = 2, 2, 8, 4, 4
    N, T = 2, 16

    key = jax.random.PRNGKey(0)
    kx, km, kp = jax.random.split(key, 3)
    x = jax.random.normal(kx, (N, dim, T), jnp.float32)
    # binary mask (mostly ones, last few frames masked for batch element 1)
    mask = jnp.ones((N, num_classes, T), jnp.float32)
    mask = mask.at[1, :, T - 3:].set(0.0)

    stage_keys = jax.random.split(kp, num_stages)
    all_params = [make_stage_params(stage_keys[0], num_layers, num_f_maps,
                                    dim, num_classes)]
    for s in range(1, num_stages):
        all_params.append(make_stage_params(stage_keys[s], num_layers,
                                            num_f_maps, num_classes, num_classes))

    ref = _ref_ms_tcn(all_params, x, mask)

    # f32 MXU-operand path (tolerance allows for MXU matmul precision mode)
    out_f32 = jax.block_until_ready(
        ms_tcn_forward(all_params, x, mask, compute_dtype=jnp.float32))
    assert out_f32.shape == (num_stages, N, num_classes, T)
    np.testing.assert_allclose(np.asarray(out_f32), np.asarray(ref),
                               rtol=2e-2, atol=2e-2)

    # default bf16 MXU-operand path (f32 accumulation) -- perf default
    out_bf16 = jax.block_until_ready(ms_tcn_forward(all_params, x, mask))
    assert out_bf16.shape == (num_stages, N, num_classes, T)
    np.testing.assert_allclose(np.asarray(out_bf16), np.asarray(ref),
                               rtol=1e-1, atol=1e-1)

    print("KERNEL_OK")
</pallas_src>

<mosaic_0001>
module attributes {stable_mosaic.version = 11 : i64} {
  func.func @_fused_stage_kernel(%arg0: i32, %arg1: i32, %arg2: memref<1x4x16xf32, #tpu.memory_space<vmem>>, %arg3: memref<1x1x16xf32, #tpu.memory_space<vmem>>, %arg4: memref<8x4xf32, #tpu.memory_space<vmem>>, %arg5: memref<8x1xf32, #tpu.memory_space<vmem>>, %arg6: memref<2x8x8xf32, #tpu.memory_space<vmem>>, %arg7: memref<2x8x8xf32, #tpu.memory_space<vmem>>, %arg8: memref<2x8x8xf32, #tpu.memory_space<vmem>>, %arg9: memref<2x8x1xf32, #tpu.memory_space<vmem>>, %arg10: memref<2x8x8xf32, #tpu.memory_space<vmem>>, %arg11: memref<2x8x1xf32, #tpu.memory_space<vmem>>, %arg12: memref<4x8xf32, #tpu.memory_space<vmem>>, %arg13: memref<4x1xf32, #tpu.memory_space<vmem>>, %arg14: memref<1x4x16xf32, #tpu.memory_space<vmem>>, %arg15: memref<8x272xf32, #tpu.memory_space<vmem>>) attributes {dimension_semantics = [#tpu.dimension_semantics<parallel>, #tpu.dimension_semantics<arbitrary>], iteration_bounds = array<i64: 2, 1>, scalar_prefetch = 0 : i64, scratch_operands = 1 : i64, tpu.core_type = #tpu.core_type<tc>, window_params = [{transform_indices = @transform_0, window_bounds = array<i64: 1, 4, 16>}, {transform_indices = @transform_1, window_bounds = array<i64: 1, 1, 16>}, {transform_indices = @transform_2, window_bounds = array<i64: 8, 4>}, {pipeline_mode = #tpu.pipeline_mode<synchronous>, transform_indices = @transform_3, window_bounds = array<i64: 8, 1>}, {pipeline_mode = #tpu.pipeline_mode<synchronous>, transform_indices = @transform_4, window_bounds = array<i64: 2, 8, 8>}, {pipeline_mode = #tpu.pipeline_mode<synchronous>, transform_indices = @transform_5, window_bounds = array<i64: 2, 8, 8>}, {pipeline_mode = #tpu.pipeline_mode<synchronous>, transform_indices = @transform_6, window_bounds = array<i64: 2, 8, 8>}, {pipeline_mode = #tpu.pipeline_mode<synchronous>, transform_indices = @transform_7, window_bounds = array<i64: 2, 8, 1>}, {pipeline_mode = #tpu.pipeline_mode<synchronous>, transform_indices = @transform_8, window_bounds = array<i64: 2, 8, 8>}, {pipeline_mode = #tpu.pipeline_mode<synchronous>, transform_indices = @transform_9, window_bounds = array<i64: 2, 8, 1>}, {pipeline_mode = #tpu.pipeline_mode<synchronous>, transform_indices = @transform_10, window_bounds = array<i64: 4, 8>}, {pipeline_mode = #tpu.pipeline_mode<synchronous>, transform_indices = @transform_11, window_bounds = array<i64: 4, 1>}, {transform_indices = @transform_12, window_bounds = array<i64: 1, 4, 16>}]} {
    %c0 = arith.constant 0 : index
    %c0_0 = arith.constant 0 : index
    %c0_1 = arith.constant 0 : index
    %0 = vector.load %arg2[%c0, %c0_0, %c0_1] : memref<1x4x16xf32, #tpu.memory_space<vmem>>, vector<1x4x16xf32>
    %1 = vector.shape_cast %0 : vector<1x4x16xf32> to vector<4x16xf32>
    %c0_2 = arith.constant 0 : index
    %c0_3 = arith.constant 0 : index
    %2 = vector.load %arg4[%c0_2, %c0_3] : memref<8x4xf32, #tpu.memory_space<vmem>>, vector<8x4xf32>
    %cst = arith.constant dense<0.000000e+00> : vector<8x16xf32>
    %3 = tpu.matmul %2, %1, %cst {dimension_numbers = #tpu.dot_dimension_numbers<[1], [0], [0], [1], [0, 0, 1, 1], [], []>} : vector<8x4xf32>, vector<4x16xf32>, vector<8x16xf32> -> vector<8x16xf32>
    %c0_i32 = arith.constant 0 : i32
    %4 = arith.cmpi eq, %arg1, %c0_i32 : i32
    %5 = arith.extui %4 : i1 to i32
    %c0_i32_4 = arith.constant 0 : i32
    %6 = arith.cmpi ne, %5, %c0_i32_4 : i32
    scf.if %6 {
      %cst_9 = arith.constant 0.000000e+00 : f32
      %13 = vector.broadcast %cst_9 : f32 to vector<8x128xf32>
      %c0_10 = arith.constant 0 : index
      %c0_11 = arith.constant 0 : index
      %14 = vector.load %arg15[%c0_10, %c0_11] : memref<8x272xf32, #tpu.memory_space<vmem>>, vector<8x128xf32>
      tpu.vector_store %arg15[%c0_10, %c0_11], %13 {strides = array<i32>} : memref<8x272xf32, #tpu.memory_space<vmem>>, vector<8x128xf32>,
      %c0_12 = arith.constant 0 : index
      %c144 = arith.constant 144 : index
      %15 = vector.load %arg15[%c0_12, %c144] : memref<8x272xf32, #tpu.memory_space<vmem>>, vector<8x128xf32>
      tpu.vector_store %arg15[%c0_12, %c144], %13 {strides = array<i32>} : memref<8x272xf32, #tpu.memory_space<vmem>>, vector<8x128xf32>,
      %c0_13 = arith.constant 0 : index
      %c128 = arith.constant 128 : index
      %16 = vector.load %arg15[%c0_13, %c128] : memref<8x272xf32, #tpu.memory_space<vmem>>, vector<8x16xf32>
      tpu.vector_store %arg15[%c0_13, %c128], %3 {strides = array<i32>} : memref<8x272xf32, #tpu.memory_space<vmem>>, vector<8x16xf32>,
    } else {
    }
    %c0_i32_5 = arith.constant 0 : i32
    %7 = arith.cmpi sgt, %arg1, %c0_i32_5 : i32
    %8 = arith.extui %7 : i1 to i32
    %c0_i32_6 = arith.constant 0 : i32
    %9 = arith.cmpi ne, %8, %c0_i32_6 : i32
    scf.if %9 {
      %c0_9 = arith.constant 0 : index
      %c128 = arith.constant 128 : index
      %13 = vector.load %arg15[%c0_9, %c128] : memref<8x272xf32, #tpu.memory_space<vmem>>, vector<8x16xf32>
      %14 = arith.addf %13, %3 : vector<8x16xf32>
      %c0_10 = arith.constant 0 : index
      %c128_11 = arith.constant 128 : index
      %15 = vector.load %arg15[%c0_10, %c128_11] : memref<8x272xf32, #tpu.memory_space<vmem>>, vector<8x16xf32>
      tpu.vector_store %arg15[%c0_10, %c128_11], %14 {strides = array<i32>} : memref<8x272xf32, #tpu.memory_space<vmem>>, vector<8x16xf32>,
    } else {
    }
    %c0_i32_7 = arith.constant 0 : i32
    %10 = arith.cmpi eq, %arg1, %c0_i32_7 : i32
    %11 = arith.extui %10 : i1 to i32
    %c0_i32_8 = arith.constant 0 : i32
    %12 = arith.cmpi ne, %11, %c0_i32_8 : i32
    scf.if %12 {
      %c0_9 = arith.constant 0 : index
      %c128 = arith.constant 128 : index
      %13 = vector.load %arg15[%c0_9, %c128] : memref<8x272xf32, #tpu.memory_space<vmem>>, vector<8x16xf32>
      %c0_10 = arith.constant 0 : index
      %c0_11 = arith.constant 0 : index
      %14 = vector.load %arg5[%c0_10, %c0_11] : memref<8x1xf32, #tpu.memory_space<vmem>>, vector<8x1xf32>
      %15 = vector.broadcast %14 : vector<8x1xf32> to vector<8x16xf32>
      %16 = arith.addf %13, %15 : vector<8x16xf32>
      %c0_12 = arith.constant 0 : index
      %c128_13 = arith.constant 128 : index
      %17 = vector.load %arg15[%c0_12, %c128_13] : memref<8x272xf32, #tpu.memory_space<vmem>>, vector<8x16xf32>
      tpu.vector_store %arg15[%c0_12, %c128_13], %16 {strides = array<i32>} : memref<8x272xf32, #tpu.memory_space<vmem>>, vector<8x16xf32>,
      %c0_14 = arith.constant 0 : index
      %c128_15 = arith.constant 128 : index
      %18 = vector.load %arg15[%c0_14, %c128_15] : memref<8x272xf32, #tpu.memory_space<vmem>>, vector<8x16xf32>
      %c0_16 = arith.constant 0 : index
      %c127 = arith.constant 127 : index
      %19 = vector.load %arg15[%c0_16, %c127] : memref<8x272xf32, #tpu.memory_space<vmem>>, vector<8x16xf32>
      %c0_17 = arith.constant 0 : index
      %c129 = arith.constant 129 : index
      %20 = vector.load %arg15[%c0_17, %c129] : memref<8x272xf32, #tpu.memory_space<vmem>>, vector<8x16xf32>
      %c0_18 = arith.constant 0 : index
      %c0_19 = arith.constant 0 : index
      %c0_20 = arith.constant 0 : index
      %21 = vector.load %arg6[%c0_18, %c0_19, %c0_20] : memref<2x8x8xf32, #tpu.memory_space<vmem>>, vector<1x8x8xf32>
      %22 = vector.shape_cast %21 : vector<1x8x8xf32> to vector<8x8xf32>
      %cst_21 = arith.constant dense<0.000000e+00> : vector<8x16xf32>
      %23 = tpu.matmul %22, %19, %cst_21 {dimension_numbers = #tpu.dot_dimension_numbers<[1], [0], [0], [1], [0, 0, 1, 1], [], []>} : vector<8x8xf32>, vector<8x16xf32>, vector<8x16xf32> -> vector<8x16xf32>
      %c0_22 = arith.constant 0 : index
      %c0_23 = arith.constant 0 : index
      %c0_24 = arith.constant 0 : index
      %24 = vector.load %arg7[%c0_22, %c0_23, %c0_24] : memref<2x8x8xf32, #tpu.memory_space<vmem>>, vector<1x8x8xf32>
      %25 = vector.shape_cast %24 : vector<1x8x8xf32> to vector<8x8xf32>
      %cst_25 = arith.constant dense<0.000000e+00> : vector<8x16xf32>
      %26 = tpu.matmul %25, %18, %cst_25 {dimension_numbers = #tpu.dot_dimension_numbers<[1], [0], [0], [1], [0, 0, 1, 1], [], []>} : vector<8x8xf32>, vector<8x16xf32>, vector<8x16xf32> -> vector<8x16xf32>
      %27 = arith.addf %23, %26 : vector<8x16xf32>
      %c0_26 = arith.constant 0 : index
      %c0_27 = arith.constant 0 : index
      %c0_28 = arith.constant 0 : index
      %28 = vector.load %arg8[%c0_26, %c0_27, %c0_28] : memref<2x8x8xf32, #tpu.memory_space<vmem>>, vector<1x8x8xf32>
      %29 = vector.shape_cast %28 : vector<1x8x8xf32> to vector<8x8xf32>
      %cst_29 = arith.constant dense<0.000000e+00> : vector<8x16xf32>
      %30 = tpu.matmul %29, %20, %cst_29 {dimension_numbers = #tpu.dot_dimension_numbers<[1], [0], [0], [1], [0, 0, 1, 1], [], []>} : vector<8x8xf32>, vector<8x16xf32>, vector<8x16xf32> -> vector<8x16xf32>
      %31 = arith.addf %27, %30 : vector<8x16xf32>
      %c0_30 = arith.constant 0 : index
      %c0_31 = arith.constant 0 : index
      %c0_32 = arith.constant 0 : index
      %32 = vector.load %arg9[%c0_30, %c0_31, %c0_32] : memref<2x8x1xf32, #tpu.memory_space<vmem>>, vector<1x8x1xf32>
      %33 = vector.shape_cast %32 : vector<1x8x1xf32> to vector<8x1xf32>
      %34 = vector.broadcast %33 : vector<8x1xf32> to vector<8x16xf32>
      %35 = arith.addf %31, %34 : vector<8x16xf32>
      %cst_33 = arith.constant 0.000000e+00 : f32
      %36 = vector.broadcast %cst_33 : f32 to vector<8x16xf32>
      %37 = arith.maximumf %35, %36 : vector<8x16xf32>
      %c0_34 = arith.constant 0 : index
      %c0_35 = arith.constant 0 : index
      %c0_36 = arith.constant 0 : index
      %38 = vector.load %arg10[%c0_34, %c0_35, %c0_36] : memref<2x8x8xf32, #tpu.memory_space<vmem>>, vector<1x8x8xf32>
      %39 = vector.shape_cast %38 : vector<1x8x8xf32> to vector<8x8xf32>
      %cst_37 = arith.constant dense<0.000000e+00> : vector<8x16xf32>
      %40 = tpu.matmul %39, %37, %cst_37 {dimension_numbers = #tpu.dot_dimension_numbers<[1], [0], [0], [1], [0, 0, 1, 1], [], []>} : vector<8x8xf32>, vector<8x16xf32>, vector<8x16xf32> -> vector<8x16xf32>
      %c0_38 = arith.constant 0 : index
      %c0_39 = arith.constant 0 : index
      %c0_40 = arith.constant 0 : index
      %41 = vector.load %arg11[%c0_38, %c0_39, %c0_40] : memref<2x8x1xf32, #tpu.memory_space<vmem>>, vector<1x8x1xf32>
      %42 = vector.shape_cast %41 : vector<1x8x1xf32> to vector<8x1xf32>
      %43 = vector.broadcast %42 : vector<8x1xf32> to vector<8x16xf32>
      %44 = arith.addf %40, %43 : vector<8x16xf32>
      %45 = arith.addf %18, %44 : vector<8x16xf32>
      %c0_41 = arith.constant 0 : index
      %c128_42 = arith.constant 128 : index
      %46 = vector.load %arg15[%c0_41, %c128_42] : memref<8x272xf32, #tpu.memory_space<vmem>>, vector<8x16xf32>
      tpu.vector_store %arg15[%c0_41, %c128_42], %45 {strides = array<i32>} : memref<8x272xf32, #tpu.memory_space<vmem>>, vector<8x16xf32>,
      %c0_43 = arith.constant 0 : index
      %c128_44 = arith.constant 128 : index
      %47 = vector.load %arg15[%c0_43, %c128_44] : memref<8x272xf32, #tpu.memory_space<vmem>>, vector<8x16xf32>
      %c0_45 = arith.constant 0 : index
      %c126 = arith.constant 126 : index
      %48 = vector.load %arg15[%c0_45, %c126] : memref<8x272xf32, #tpu.memory_space<vmem>>, vector<8x16xf32>
      %c0_46 = arith.constant 0 : index
      %c130 = arith.constant 130 : index
      %49 = vector.load %arg15[%c0_46, %c130] : memref<8x272xf32, #tpu.memory_space<vmem>>, vector<8x16xf32>
      %c1 = arith.constant 1 : index
      %c0_47 = arith.constant 0 : index
      %c0_48 = arith.constant 0 : index
      %50 = vector.load %arg6[%c1, %c0_47, %c0_48] : memref<2x8x8xf32, #tpu.memory_space<vmem>>, vector<1x8x8xf32>
      %51 = vector.shape_cast %50 : vector<1x8x8xf32> to vector<8x8xf32>
      %cst_49 = arith.constant dense<0.000000e+00> : vector<8x16xf32>
      %52 = tpu.matmul %51, %48, %cst_49 {dimension_numbers = #tpu.dot_dimension_numbers<[1], [0], [0], [1], [0, 0, 1, 1], [], []>} : vector<8x8xf32>, vector<8x16xf32>, vector<8x16xf32> -> vector<8x16xf32>
      %c1_50 = arith.constant 1 : index
      %c0_51 = arith.constant 0 : index
      %c0_52 = arith.constant 0 : index
      %53 = vector.load %arg7[%c1_50, %c0_51, %c0_52] : memref<2x8x8xf32, #tpu.memory_space<vmem>>, vector<1x8x8xf32>
      %54 = vector.shape_cast %53 : vector<1x8x8xf32> to vector<8x8xf32>
      %cst_53 = arith.constant dense<0.000000e+00> : vector<8x16xf32>
      %55 = tpu.matmul %54, %47, %cst_53 {dimension_numbers = #tpu.dot_dimension_numbers<[1], [0], [0], [1], [0, 0, 1, 1], [], []>} : vector<8x8xf32>, vector<8x16xf32>, vector<8x16xf32> -> vector<8x16xf32>
      %56 = arith.addf %52, %55 : vector<8x16xf32>
      %c1_54 = arith.constant 1 : index
      %c0_55 = arith.constant 0 : index
      %c0_56 = arith.constant 0 : index
      %57 = vector.load %arg8[%c1_54, %c0_55, %c0_56] : memref<2x8x8xf32, #tpu.memory_space<vmem>>, vector<1x8x8xf32>
      %58 = vector.shape_cast %57 : vector<1x8x8xf32> to vector<8x8xf32>
      %cst_57 = arith.constant dense<0.000000e+00> : vector<8x16xf32>
      %59 = tpu.matmul %58, %49, %cst_57 {dimension_numbers = #tpu.dot_dimension_numbers<[1], [0], [0], [1], [0, 0, 1, 1], [], []>} : vector<8x8xf32>, vector<8x16xf32>, vector<8x16xf32> -> vector<8x16xf32>
      %60 = arith.addf %56, %59 : vector<8x16xf32>
      %c1_58 = arith.constant 1 : index
      %c0_59 = arith.constant 0 : index
      %c0_60 = arith.constant 0 : index
      %61 = vector.load %arg9[%c1_58, %c0_59, %c0_60] : memref<2x8x1xf32, #tpu.memory_space<vmem>>, vector<1x8x1xf32>
      %62 = vector.shape_cast %61 : vector<1x8x1xf32> to vector<8x1xf32>
      %63 = vector.broadcast %62 : vector<8x1xf32> to vector<8x16xf32>
      %64 = arith.addf %60, %63 : vector<8x16xf32>
      %cst_61 = arith.constant 0.000000e+00 : f32
      %65 = vector.broadcast %cst_61 : f32 to vector<8x16xf32>
      %66 = arith.maximumf %64, %65 : vector<8x16xf32>
      %c1_62 = arith.constant 1 : index
      %c0_63 = arith.constant 0 : index
      %c0_64 = arith.constant 0 : index
      %67 = vector.load %arg10[%c1_62, %c0_63, %c0_64] : memref<2x8x8xf32, #tpu.memory_space<vmem>>, vector<1x8x8xf32>
      %68 = vector.shape_cast %67 : vector<1x8x8xf32> to vector<8x8xf32>
      %cst_65 = arith.constant dense<0.000000e+00> : vector<8x16xf32>
      %69 = tpu.matmul %68, %66, %cst_65 {dimension_numbers = #tpu.dot_dimension_numbers<[1], [0], [0], [1], [0, 0, 1, 1], [], []>} : vector<8x8xf32>, vector<8x16xf32>, vector<8x16xf32> -> vector<8x16xf32>
      %c1_66 = arith.constant 1 : index
      %c0_67 = arith.constant 0 : index
      %c0_68 = arith.constant 0 : index
      %70 = vector.load %arg11[%c1_66, %c0_67, %c0_68] : memref<2x8x1xf32, #tpu.memory_space<vmem>>, vector<1x8x1xf32>
      %71 = vector.shape_cast %70 : vector<1x8x1xf32> to vector<8x1xf32>
      %72 = vector.broadcast %71 : vector<8x1xf32> to vector<8x16xf32>
      %73 = arith.addf %69, %72 : vector<8x16xf32>
      %74 = arith.addf %47, %73 : vector<8x16xf32>
      %c0_69 = arith.constant 0 : index
      %c128_70 = arith.constant 128 : index
      %75 = vector.load %arg15[%c0_69, %c128_70] : memref<8x272xf32, #tpu.memory_space<vmem>>, vector<8x16xf32>
      tpu.vector_store %arg15[%c0_69, %c128_70], %74 {strides = array<i32>} : memref<8x272xf32, #tpu.memory_space<vmem>>, vector<8x16xf32>,
      %c0_71 = arith.constant 0 : index
      %c0_72 = arith.constant 0 : index
      %76 = vector.load %arg12[%c0_71, %c0_72] : memref<4x8xf32, #tpu.memory_space<vmem>>, vector<4x8xf32>
      %c0_73 = arith.constant 0 : index
      %c128_74 = arith.constant 128 : index
      %77 = vector.load %arg15[%c0_73, %c128_74] : memref<8x272xf32, #tpu.memory_space<vmem>>, vector<8x16xf32>
      %cst_75 = arith.constant dense<0.000000e+00> : vector<4x16xf32>
      %78 = tpu.matmul %76, %77, %cst_75 {dimension_numbers = #tpu.dot_dimension_numbers<[1], [0], [0], [1], [0, 0, 1, 1], [], []>} : vector<4x8xf32>, vector<8x16xf32>, vector<4x16xf32> -> vector<4x16xf32>
      %c0_76 = arith.constant 0 : index
      %c0_77 = arith.constant 0 : index
      %79 = vector.load %arg13[%c0_76, %c0_77] : memref<4x1xf32, #tpu.memory_space<vmem>>, vector<4x1xf32>
      %80 = vector.broadcast %79 : vector<4x1xf32> to vector<4x16xf32>
      %81 = arith.addf %78, %80 : vector<4x16xf32>
      %c0_78 = arith.constant 0 : index
      %c0_79 = arith.constant 0 : index
      %c0_80 = arith.constant 0 : index
      %82 = vector.load %arg3[%c0_78, %c0_79, %c0_80] : memref<1x1x16xf32, #tpu.memory_space<vmem>>, vector<1x1x16xf32>
      %83 = vector.shape_cast %82 : vector<1x1x16xf32> to vector<1x16xf32>
      %84 = vector.broadcast %83 : vector<1x16xf32> to vector<4x16xf32>
      %85 = arith.mulf %81, %84 : vector<4x16xf32>
      %c0_81 = arith.constant 0 : index
      %c0_82 = arith.constant 0 : index
      %c0_83 = arith.constant 0 : index
      %86 = vector.load %arg14[%c0_81, %c0_82, %c0_83] : memref<1x4x16xf32, #tpu.memory_space<vmem>>, vector<1x4x16xf32>
      %87 = vector.shape_cast %86 : vector<1x4x16xf32> to vector<4x16xf32>
      %88 = vector.shape_cast %85 : vector<4x16xf32> to vector<1x4x16xf32>
      tpu.vector_store %arg14[%c0_81, %c0_82, %c0_83], %88 {strides = array<i32>} : memref<1x4x16xf32, #tpu.memory_space<vmem>>, vector<1x4x16xf32>,
    } else {
    }
    return
  }
  func.func @transform_0(%arg0: i32, %arg1: i32) -> (i32, i32, i32) {
    %c0_i32 = arith.constant 0 : i32
    %c0_i32_0 = arith.constant 0 : i32
    return %arg0, %arg1, %c0_i32 : i32, i32, i32
  }
  func.func @transform_1(%arg0: i32, %arg1: i32) -> (i32, i32, i32) {
    %c0_i32 = arith.constant 0 : i32
    %c0_i32_0 = arith.constant 0 : i32
    %c0_i32_1 = arith.constant 0 : i32
    return %arg0, %c0_i32, %c0_i32_0 : i32, i32, i32
  }
  func.func @transform_2(%arg0: i32, %arg1: i32) -> (i32, i32) {
    %c0_i32 = arith.constant 0 : i32
    %c0_i32_0 = arith.constant 0 : i32
    return %c0_i32, %arg1 : i32, i32
  }
  func.func @transform_3(%arg0: i32, %arg1: i32) -> (i32, i32) {
    %c0_i32 = arith.constant 0 : i32
    %c0_i32_0 = arith.constant 0 : i32
    %c0_i32_1 = arith.constant 0 : i32
    return %c0_i32, %c0_i32_0 : i32, i32
  }
  func.func @transform_4(%arg0: i32, %arg1: i32) -> (i32, i32, i32) {
    %c0_i32 = arith.constant 0 : i32
    %c0_i32_0 = arith.constant 0 : i32
    %c0_i32_1 = arith.constant 0 : i32
    %c0_i32_2 = arith.constant 0 : i32
    return %c0_i32, %c0_i32_0, %c0_i32_1 : i32, i32, i32
  }
  func.func @transform_5(%arg0: i32, %arg1: i32) -> (i32, i32, i32) {
    %c0_i32 = arith.constant 0 : i32
    %c0_i32_0 = arith.constant 0 : i32
    %c0_i32_1 = arith.constant 0 : i32
    %c0_i32_2 = arith.constant 0 : i32
    return %c0_i32, %c0_i32_0, %c0_i32_1 : i32, i32, i32
  }
  func.func @transform_6(%arg0: i32, %arg1: i32) -> (i32, i32, i32) {
    %c0_i32 = arith.constant 0 : i32
    %c0_i32_0 = arith.constant 0 : i32
    %c0_i32_1 = arith.constant 0 : i32
    %c0_i32_2 = arith.constant 0 : i32
    return %c0_i32, %c0_i32_0, %c0_i32_1 : i32, i32, i32
  }
  func.func @transform_7(%arg0: i32, %arg1: i32) -> (i32, i32, i32) {
    %c0_i32 = arith.constant 0 : i32
    %c0_i32_0 = arith.constant 0 : i32
    %c0_i32_1 = arith.constant 0 : i32
    %c0_i32_2 = arith.constant 0 : i32
    return %c0_i32, %c0_i32_0, %c0_i32_1 : i32, i32, i32
  }
  func.func @transform_8(%arg0: i32, %arg1: i32) -> (i32, i32, i32) {
    %c0_i32 = arith.constant 0 : i32
    %c0_i32_0 = arith.constant 0 : i32
    %c0_i32_1 = arith.constant 0 : i32
    %c0_i32_2 = arith.constant 0 : i32
    return %c0_i32, %c0_i32_0, %c0_i32_1 : i32, i32, i32
  }
  func.func @transform_9(%arg0: i32, %arg1: i32) -> (i32, i32, i32) {
    %c0_i32 = arith.constant 0 : i32
    %c0_i32_0 = arith.constant 0 : i32
    %c0_i32_1 = arith.constant 0 : i32
    %c0_i32_2 = arith.constant 0 : i32
    return %c0_i32, %c0_i32_0, %c0_i32_1 : i32, i32, i32
  }
  func.func @transform_10(%arg0: i32, %arg1: i32) -> (i32, i32) {
    %c0_i32 = arith.constant 0 : i32
    %c0_i32_0 = arith.constant 0 : i32
    %c0_i32_1 = arith.constant 0 : i32
    return %c0_i32, %c0_i32_0 : i32, i32
  }
  func.func @transform_11(%arg0: i32, %arg1: i32) -> (i32, i32) {
    %c0_i32 = arith.constant 0 : i32
    %c0_i32_0 = arith.constant 0 : i32
    %c0_i32_1 = arith.constant 0 : i32
    return %c0_i32, %c0_i32_0 : i32, i32
  }
  func.func @transform_12(%arg0: i32, %arg1: i32) -> (i32, i32, i32) {
    %c0_i32 = arith.constant 0 : i32
    %c0_i32_0 = arith.constant 0 : i32
    %c0_i32_1 = arith.constant 0 : i32
    return %arg0, %c0_i32, %c0_i32_0 : i32, i32, i32
  }
}

</mosaic_0001>

<bundles_post_ra>
// kernel: tpu_custom_call.1
= control target key start
LH: loop header
LB: loop body
LE: loop exit
PB: predicated region body
PF: predicated region fallthrough
CT: control target
= control target key end

     0   :  { %s2203_s0 = inlined_call_operand.hbm [shape: f32[2,4,16], index: 0, kind: input, shape index: {}]   ;;  %s2204_s1 = inlined_call_operand.hbm [shape: f32[2,1,16], index: 1, kind: input, shape index: {}]   ;;  %s2205_s2 = inlined_call_operand.vmem [shape: f32[8,4], index: 2, kind: input, shape index: {}]   ;;  %s2206_s3 = inlined_call_operand.vmem [shape: f32[8,1], index: 3, kind: input, shape index: {}]   ;;  %s2207_s4 = inlined_call_operand.vmem [shape: f32[2,8,8], index: 4, kind: input, shape index: {}]   ;;  %s2208_s5 = inlined_call_operand.vmem [shape: f32[2,8,8], index: 5, kind: input, shape index: {}]   ;;  %s2209_s6 = inlined_call_operand.vmem [shape: f32[2,8,8], index: 6, kind: input, shape index: {}]   ;;  %s2210_s7 = inlined_call_operand.vmem [shape: f32[2,8,1], index: 7, kind: input, shape index: {}]   ;;  %s2211_s8 = inlined_call_operand.vmem [shape: f32[2,8,8], index: 8, kind: input, shape index: {}]   ;;  %s2212_s9 = inlined_call_operand.vmem [shape: f32[2,8,1], index: 9, kind: input, shape index: {}]   ;;  %s2213_s10 = inlined_call_operand.vmem [shape: f32[4,8], index: 10, kind: input, shape index: {}]   ;;  %s2214_s11 = inlined_call_operand.vmem [shape: f32[4,1], index: 11, kind: input, shape index: {}]   ;;  %s2215_s12 = inlined_call_operand.hbm [shape: f32[2,4,16], index: 12, kind: output, shape index: {}]  }
   0x1   :  { %2223 = sst [smem:[#allocation18_spill]] %s2203_s0 }
   0x2   :  { %17 = vsyncpa [#allocation4], 0 }
   0x3   :  { %19 = vsyncpa [#allocation4 + $0x1], 0 }
   0x4   :  { %20 = vsyncpa [#allocation7], 0 }
   0x5   :  { %22 = vsyncpa [#allocation7 + $0x1], 0 }
   0x6   :  { %23 = vsyncpa [#allocation5], 0 }
   0x7   :  { %25 = vsyncpa [#allocation5 + $0x1], 0  ;;  %s1888_s21 = smov 0   ;;  %s1890_s22 = smov 0  }
   0x8   :  { %s1892_s23 = smov 0   ;;  %s1894_s24 = smov 0  }
   0x9   :  { %s1896_s25 = smov 0   ;;  %s1898_s26 = smov 0  }
   0xa LB: > { %2224 = sst [smem:[#allocation12_spill]] %s1791_s21  ;;  %s1486_s27 = sadd.s32 4294967295, %s1811_s26   ;;  %s1811_s26 = sphi %s1898_s26, %s31_s26   ;;  %s1807_s25 = sphi %s1896_s25, %s2249_s25   ;;  %s1803_s24 = sphi %s1894_s24, %s2248_s24   ;;  %s1799_s23 = sphi %s1892_s23, %s2247_s23   ;;  %s1795_s22 = sphi %s1890_s22, %s2251_s22   ;;  %s1791_s21 = sphi %s1888_s21, %s2250_s21  }
   0xb   : > { %2225 = sst [smem:[#allocation13_spill]] %s1799_s23  ;;  %s1487_s28 = sadd.s32 4294967294, %s1811_s26  }
   0xc   : > { %2226 = sst [smem:[#allocation14_spill]] %s1807_s25  ;;  %s43_s29 = sadd.s32 1, %s1807_s25 }
   0xd   : > { %s52_s30 = sadd.s32 1, %s1799_s23  ;;  %p45_p0 = scmp.ge.s32.totalorder %s43_s29, 2 }
   0xe   : > { %p59_p1 = scmp.ne.s32.totalorder %s1799_s23, %s1795_s22  ;;  %p60_p2 = scmp.eq.s32.totalorder %s1811_s26, 0 }
   0xf   : > { %p65_p3 = scmp.ne.s32.totalorder %s1795_s22, %s1791_s21  ;;  %s2253_s29 = smov (%p45_p0, %s43_s29), 0 }
  0x10   : > { %2227 = sst [smem:[#allocation15_spill]] %s2253_s29  ;;  %p1929_p4 = por %p60_p2, %p59_p1 }
  0x11   : > { %p66_p5 = scmp.eq.s32.totalorder %s1486_s27, 0  ;;  %s47_s14 = ssub.s32 %s1807_s25, %s2253_s29 }
  0x12   : > { %p330_p6 = scmp.eq.s32.totalorder %s1486_s27, 1  ;;  %p50_p7 = scmp.eq.s32.totalorder %s47_s14, 0 }
  0x13   : > { %p1935_p8 = por %p66_p5, %p65_p3  ;;  %p336_p10 = scmp.eq.s32.totalorder %s1487_s28, 1 }
  0x14   : > { %p1939_p9 = por %p330_p6, %p59_p1  ;;  %p1606_p13 = scmp.lt.s32.totalorder %s1811_s26, 2 }
  0x15   : > { %s2229_s15 = scalar_select %p1935_p8, 1, 0 }
  0x16   : > { %s2230_s16 = scalar_select %p1939_p9, 1, 0 }
  0x17   : > { %s1944_s17 = scalar_select %p50_p7, %s1799_s23, %s52_s30  }
  0x18   : > { %p1946_p11 = por %p336_p10, %p65_p3  ;;  %s1953_s19 = sand.u32 1, %s1799_s23  }
  0x19   : > { %2231 = sst [smem:[#allocation16_spill]] %s1944_s17  ;;  %s1491_s20 = sshll.u32 %s1953_s19, 2 }
  0x1a   : > { %s2232_s18 = scalar_select %p1946_p11, 1, 0 }
  0x1b   : > { %s1492_s27 = sshll.u32 %s1807_s25, 6  ;;  %s2234_s0 = sld [smem:[#allocation18_spill]] }
  0x1c   : > { %2233 = sst [smem:[#allocation17_spill]] %s2232_s18  ;;  %s394_s28 = scalar_lea.vmem [#allocation3], %s1491_s20 }
  0x1d   : > { %s402_s30 = sshll.u32 %s394_s28, 4  ;;  %p1966_p0 = pnand %p1606_p13, %p1929_p4  ;;  %s1962_s30 = int_to_ptr.vmem [resolvable:$true] %s402_s30 }
  0x1e   : > { %s391_s29 = scalar_lea.sflag [#allocation4], %s1953_s19 }
  0x1f   : > { %p1667_p5 = pneg %p1966_p0 }
  0x21   : > { %s1960_s21 = scalar_lea.hbm %s2234_s0, %s1492_s27  ;;  %s1670_s13 = scalar_lea.hbm %s2234_s0, 128 }
  0x22   : > { %s1665_s27 = scalar_lea.hbm %s1960_s21, 64  ;;  %p1671_p4 = scmp.lt.u32.totalorder %s1960_s21, %s2234_s0 }
  0x23   : > { %p1666_p3 = scmp.ne.s32.totalorder %s1960_s21, %s1665_s27  ;;  %p1672_p10 = scmp.lt.u32.totalorder %s1670_s13, %s1665_s27 }
  0x24   : > { %p1674_p12 = scmp.lt.u32.totalorder %s1665_s27, %s1960_s21 }
  0x25   : > { %p1668_p6 = pnand %p1667_p5, %p1666_p3  ;;  %p1673_p13 = por %p1672_p10, %p1671_p4 }
  0x27   : > { %p1669_p7 = pneg %p1668_p6  ;;  %p1675_p1 = por %p1674_p12, %p1673_p13 }
  0x29   : > { %p1676_p2 = pnand %p1675_p1, %p1669_p7 }
  0x2b   : > { %1679 = shalt.err (!%p1676_p2)
}
  0x2c   : > { %s1680_s18 = scalar_lea.vmem %s1962_s30, 64  ;;  %s1813_s20 = smov [#allocation3]  }
  0x2d   : > { %p1681_p3 = scmp.ne.s32.totalorder %s1962_s30, %s1680_s18  ;;  %s1685_s14 = sshll.u32 %s1813_s20, 4  ;;  %s1686_s14 = int_to_ptr.vmem [resolvable:$false] %s1685_s14 }
  0x2e   : > { %s1687_s23 = scalar_lea.vmem %s1686_s14, 128  ;;  %p1688_p9 = scmp.lt.s32.totalorder %s1962_s30, %s1686_s14 }
  0x2f   : > { %p1683_p6 = pnand %p1681_p3, %p1667_p5  ;;  %p1689_p4 = scmp.lt.s32.totalorder %s1687_s23, %s1680_s18 }
  0x31   : > { %p1684_p11 = pneg %p1683_p6  ;;  %p1690_p10 = por %p1689_p4, %p1688_p9 }
  0x33   : > { %p1691_p12 = pnand %p1690_p10, %p1684_p11 }
  0x35   : > { %1694 = shalt.err (!%p1691_p12)
}
  0x36   : > { %1598 = dma.hbm_to_vmem [thread:$0]  (!%p1966_p0), %s1960_s21, 64, %s1962_s30, %s391_s29  }
  0x37   : > { %p2236_p1 = scmp.lt.s32.totalorder %s1811_s26, 3  ;;  %p2237_p2 = scmp.ge.s32.totalorder %s1811_s26, 1 }
  0x38   : > { %s1493_s18 = sshll.u32 %s1807_s25, 4  ;;  %s412_s13 = scalar_lea.vmem [#allocation6], %s1953_s19 }
  0x39   : > { %p2002_p7 = pnand %p2237_p2, %p2236_p1  ;;  %s419_s28 = sshll.u32 %s412_s13, 4  ;;  %s420_s28 = int_to_ptr.vmem [resolvable:$true] %s419_s28 }
  0x3a   : > { %s2011_s23 = scalar_lea.hbm %s2204_s1, %s1493_s18  ;;  %s410_s21 = scalar_lea.sflag [#allocation7], %s1953_s19 }
  0x3b   : > { %s2238_s27 = scalar_select %p2002_p7, 1, 0 }
  0x3c   : > { %s1695_s30 = scalar_lea.hbm %s2011_s23, 16  ;;  %s1700_s13 = scalar_lea.hbm %s2204_s1, 32 }
  0x3d   : > { %p1696_p9 = scmp.ne.s32.totalorder %s2011_s23, %s1695_s30  ;;  %p1701_p3 = scmp.lt.u32.totalorder %s2011_s23, %s2204_s1 }
  0x3e   : > { %p1702_p6 = scmp.lt.u32.totalorder %s1700_s13, %s1695_s30  ;;  %p1704_p10 = scmp.lt.u32.totalorder %s1695_s30, %s2011_s23 }
  0x3f   : > { %p1698_p11 = pnand %p1696_p9, %p1667_p5 }
  0x40   : > { %p1703_p4 = por %p1702_p6, %p1701_p3 }
  0x41   : > { %p1699_p13 = pneg %p1698_p11 }
  0x42   : > { %p1705_p12 = por %p1704_p10, %p1703_p4 }
  0x44   : > { %p1706_p1 = pnand %p1705_p12, %p1699_p13 }
  0x46   : > { %1709 = shalt.err (!%p1706_p1)
}
  0x47   : > { %s1710_s19 = scalar_lea.vmem %s420_s28, 16  ;;  %s1814_s18 = smov [#allocation6]  }
  0x48   : > { %p1711_p2 = scmp.ne.s32.totalorder %s420_s28, %s1710_s19  ;;  %s1715_s0 = sshll.u32 %s1814_s18, 4  ;;  %s1716_s0 = int_to_ptr.vmem [resolvable:$false] %s1715_s0 }
  0x49   : > { %s1717_s14 = scalar_lea.vmem %s1716_s0, 32  ;;  %p1718_p8 = scmp.lt.s32.totalorder %s420_s28, %s1716_s0 }
  0x4a   : > { %p1713_p9 = pnand %p1711_p2, %p1667_p5  ;;  %p1719_p7 = scmp.lt.s32.totalorder %s1717_s14, %s1710_s19 }
  0x4c   : > { %p1714_p11 = pneg %p1713_p9  ;;  %p1720_p3 = por %p1719_p7, %p1718_p8 }
  0x4e   : > { %p1721_p6 = pnand %p1720_p3, %p1714_p11 }
  0x50   : > { %1724 = shalt.err (!%p1721_p6)
}
  0x51   : > { %1601 = dma.hbm_to_vmem [thread:$0]  (!%p1966_p0), %s2011_s23, 16, %s420_s28, %s410_s21  }
  0x52   : > { %p2239_p13 = scmp.ne.s32.totalorder %s2238_s27, 0 }
  0x53   : > { %s2036_s25 = sand.u32 (!%p2239_p13), 1, %s1795_s22   ;;  %p2240_p8 = scmp.ne.s32.totalorder (!%p2239_p13), %s2229_s15, 0 }
  0x54   : > { %428 = sbr.rel (%p2239_p13) target bundleno = 1685 (0x695), region = 68  ;;  %s1495_s30 = sshll.u32 (!%p2239_p13), %s2036_s25, 2 }
  0x55   : > { %s431_s29 = scalar_lea.sflag (!%p2239_p13), [#allocation4], %s2036_s25  ;;  %s434_s13 = scalar_lea.vmem (!%p2239_p13), [#allocation3], %s1495_s30 }
  0x5b   : > { %1778 = dma.done.wait (%p2240_p8), %s431_s29, 64  }
  0x5c   : > { %1780 = vsyncadd (%p2240_p8), %s431_s29, 4294967232  ;;  %s440_s17 = scalar_lea.sflag [#allocation7], %s2036_s25  ;;  %s442_s27 = scalar_lea.vmem [#allocation6], %s2036_s25 }
  0x5d   : > { %1782 = dma.done.wait (%p2240_p8), %s440_s17, 16  }
  0x5e   : > { %1784 = vsyncadd (%p2240_p8), %s440_s17, 4294967280  ;;  %v1815_v0 = vmov 0.0   ;;  %vm1816_vm0 = vmmov 0   ;;  %v1817_v1 = vmov 0   ;;  %vm501_vm1 = vcmask 1043456   ;;  %v496_v3 = vld [vmem:[%s2205_s2] sm:$0xff] }
  0x5f   : > { %1539 = vmatprep.subr.mxu0 %v1815_v0  ;;  %1541 = vmatprep.mubr.msk.f32.mxu0 %vm1816_vm0, %v1815_v0  ;;  %vm497_vm2 = vcmask 31744   ;;  %v495_v2 = vld [vmem:[%s434_s13] sm:$0xf]  ;;  %v597_v4 = vld [vmem:[%s2206_s3] sm:$0xff]  ;;  %s1818_s20 = smov 1   ;;  %vm580_vm3 = vcmask 1047680  }
  0x60   : > { %1663 = vset.pattern.permute.xlu0 %v1817_v1  ;;  %1544 = vmatprep.subr.mxu1 %v1815_v0  ;;  %v844_v5 = vld [vmem:[%s2210_s7] sm:$0xff]  ;;  %581 = vst.msk [vmem:[#allocation2 + $0x8] sm:$0xff] %vm580_vm3, %v1815_v0  ;;  %vm582_vm4 = vcmask 130048   ;;  %vm610_vm5 = vcmask 64512   ;;  %s1819_s29 = smov 127   ;;  %vm690_vm6 = vcmask 7168  }
  0x61   : > { %1546 = vmatprep.mubr.msk.f32.mxu1 %vm1816_vm0, %v1815_v0  ;;  %1664 = vset.pattern.permute.xlu1 %v1817_v1  ;;  %v609_v11 = vld [vmem:[%s2208_s5] sm:$0xff]  ;;  %s1820_s18 = smov 2   ;;  %v1504_v38 = vld [vmem:[%s2208_s5 + $0x8] sm:$0xff]  ;;  %vm1019_vm7 = vcmask 15360   ;;  %s1516_s15 = sshll.u32 %s1803_s24, 6  ;;  %vm1356_vm8 = vcmask 125952  }
  0x62   : > { %1540 = vmatpush3.msk.msra.mxu0 %vm501_vm1, %v495_v2  ;;  %600 = vperm.xlu0 %1663, %v597_v4   ;;  %v608_v15 = vld [vmem:[%s2207_s4] sm:$0xff]  ;;  %v1511_v39 = vld [vmem:[%s2212_s9 + $0x8] sm:$0xff]  ;;  %s490_s28 = scalar_lea.vmem [#allocation8], %s1495_s30  ;;  %s2154_s19 = scalar_lea.hbm %s2215_s12, %s1516_s15 }
  0x63   : > { %1542 = vmatmul.mubr.msk.f32.vlgmr.msra.gmra.mrb[0].mxu0 %vm497_vm2, %v496_v3  ;;  %1549 = vmatprep.subr.mxu0 %v1815_v0  ;;  %v766_v17 = vld [vmem:[%s2209_s6] sm:$0xff]  ;;  %v1509_v40 = vld [vmem:[%s2210_s7 + $0x8] sm:$0xff]  ;;  %s1372_s23 = sshll.u32 %s490_s28, 4  ;;  %p2241_p5 = scmp.ne.s32.totalorder %s2230_s16, 0  ;;  %s2156_s23 = int_to_ptr.vmem [resolvable:$true] %s1372_s23 }
  0x64   : > { %1551 = vmatprep.mubr.msk.f32.mxu0 %vm1816_vm0, %v1815_v0  ;;  %v853_v19 = vld [vmem:[%s2212_s9] sm:$0xff]  ;;  %v1507_v43 = vld [vmem:[%s2209_s6 + $0x8] sm:$0xff]  ;;  %s1725_s24 = scalar_lea.vmem %s2156_s23, 64  ;;  %s1822_s30 = smov [#allocation8]  }
  0x65   : > { %v852_v31 = vld [vmem:[%s2211_s8] sm:$0xff]  ;;  %v1503_v46 = vld [vmem:[%s2207_s4 + $0x8] sm:$0xff]  ;;  %p1726_p0 = scmp.ne.s32.totalorder %s2156_s23, %s1725_s24 }
  0x66   : > { %686 = vrot.lane.b32.xlu0 %v1815_v0, %s1818_s20  ;;  %v1269_v41 = vld [vmem:[%s2214_s11] sm:$0xf]  ;;  %v1510_v59 = vld [vmem:[%s2211_s8 + $0x8] sm:$0xff] }
  0x67   : > { %v1267_v1 = vld [vmem:[%s2213_s10] sm:$0xf]  ;;  %p1727_p7 = pnand %p1726_p0, %p2241_p5 }
  0x69   : > { %p1728_p4 = pneg %p1727_p7 }
  0x6a   : > { %847 = vperm.xlu0 %1663, %v844_v5   ;;  %v1514_v5 = vld [vmem:[%s442_s27] ss:$0 sm:$0xff]  ;;  %s1359_s27 = scalar_lea.sflag [#allocation5], %s2036_s25 }
  0x6e   : > { %1015 = vrot.lane.b32.xlu0 %v1815_v0, %s1820_s18 }
  0xe1   : > { %v601_v8 = vpop.permute.xlu0 %600 }
  0xe5   : > { %v687_v13 = vpop.permute.xlu0 %686 }
  0xe9   : > { %v848_v28 = vpop.permute.xlu0 %847 }
  0xed   : > { %v1016_v42 = vpop.permute.xlu0 %1015 }
 0x136   : > { %v571_v6 = vpop.f32.mrb[0].mxu0 }
 0x137   : > { %584 = vst.msk [vmem:[#allocation2 + $0x8] sm:$0xff] %vm582_vm4, %v571_v6  ;;  %v1543_v7 = vpop.f32.mrb[1].mxu0 }
 0x13e   : > { %v596_v9 = vld [vmem:[#allocation2 + $0x8] sm:$0xff] }
 0x13f   : > { %v603_v10 = vadd.f32 %v601_v8, %v596_v9 }
 0x141   : > { %605 = vst.msk [vmem:[#allocation2 + $0x8] sm:$0xff] %vm582_vm4, %v603_v10 }
 0x148   : > { %v606_v12 = vld [vmem:[#allocation2 + $0x8] sm:$0xff] }
 0x149   : > { %688 = vrot.lane.b32.xlu1 %v606_v12, %s1818_s20  ;;  %1545 = vmatpush3.msra.mxu1 %v606_v12 }
 0x14a   : > { %1547 = vmatmul.mubr.msk.f32.vlgmr.msra.gmra.mrb[0].mxu1 %vm610_vm5, %v609_v11  ;;  %1554 = vmatprep.subr.mxu1 %v1815_v0 }
 0x14b   : > { %1556 = vmatprep.mubr.msk.f32.mxu1 %vm1816_vm0, %v1815_v0 }
 0x14d   : > { %767 = vrot.lane.b32.xlu1 %v606_v12, %s1819_s29  ;;  %s1821_s29 = smov 126  }
 0x151   : > { %856 = vperm.xlu1 %1664, %v853_v19  }
 0x1bb   : > { %v689_v14 = vpop.permute.xlu1 %688 }
 0x1bc   : > { %v691_v16 = vsel %vm690_vm6, %v687_v13, %v689_v14 }
 0x1bd   : > { %1550 = vmatpush3.msra.mxu0 %v691_v16 }
 0x1be   : > { %1552 = vmatmul.mubr.msk.f32.vlgmr.msra.gmra.mrb[2].mxu0 %vm610_vm5, %v608_v15  ;;  %1559 = vmatprep.subr.mxu0 %v1815_v0 }
 0x1bf   : > { %v768_v18 = vpop.permute.xlu1 %767  ;;  %1561 = vmatprep.mubr.msk.f32.mxu0 %vm1816_vm0, %v1815_v0 }
 0x1c0   : > { %1555 = vmatpush3.msra.mxu1 %v768_v18 }
 0x1c1   : > { %1557 = vmatmul.mubr.msk.f32.vlgmr.msra.gmra.mrb[2].mxu1 %vm610_vm5, %v766_v17  ;;  %1564 = vmatprep.subr.mxu1 %v1815_v0 }
 0x1c2   : > { %1566 = vmatprep.mubr.msk.f32.mxu1 %vm1816_vm0, %v1815_v0 }
 0x1d0   : > { %v857_v32 = vpop.permute.xlu1 %856 }
 0x21d   : > { %v680_v20 = vpop.f32.mrb[0].mxu1 }
 0x21e   : > { %v1548_v21 = vpop.f32.mrb[1].mxu1 }
 0x291   : > { %v762_v22 = vpop.f32.mrb[2].mxu0 }
 0x292   : > { %v763_v23 = vadd.f32 %v762_v22, %v680_v20  ;;  %v1553_v24 = vpop.f32.mrb[3].mxu0 }
 0x294   : > { %v839_v25 = vpop.f32.mrb[2].mxu1 }
 0x295   : > { %v843_v26 = vadd.f32 %v839_v25, %v763_v23  ;;  %v1558_v27 = vpop.f32.mrb[3].mxu1 }
 0x297   : > { %v850_v29 = vadd.f32 %v848_v28, %v843_v26 }
 0x299   : > { %v851_v30 = vmax.f32 %v850_v29, 0.0 }
 0x29b   : > { %1560 = vmatpush3.msra.mxu0 %v851_v30 }
 0x29c   : > { %1562 = vmatmul.mubr.msk.f32.vlgmr.msra.gmra.mrb[4].mxu0 %vm610_vm5, %v852_v31  ;;  %1569 = vmatprep.subr.mxu0 %v1815_v0 }
 0x29d   : > { %1571 = vmatprep.mubr.msk.f32.mxu0 %vm1816_vm0, %v1815_v0 }
 0x36f   : > { %v928_v33 = vpop.f32.mrb[4].mxu0 }
 0x370   : > { %v929_v34 = vadd.f32 %v928_v33, %v857_v32  ;;  %v1563_v35 = vpop.f32.mrb[5].mxu0 }
 0x372   : > { %v932_v36 = vadd.f32 %v929_v34, %v606_v12 }
 0x374   : > { %933 = vst.msk [vmem:[#allocation2 + $0x8] sm:$0xff] %vm582_vm4, %v932_v36 }
 0x37b   : > { %v934_v37 = vld [vmem:[#allocation2 + $0x8] sm:$0xff] }
 0x37c   : > { %1097 = vrot.lane.b32.xlu0 %v934_v37, %s1821_s29  ;;  %1017 = vrot.lane.b32.xlu1 %v934_v37, %s1820_s18  ;;  %s1729_s18 = sshll.u32 %s1822_s30, 4  ;;  %s1730_s18 = int_to_ptr.vmem [resolvable:$false] %s1729_s18 }
 0x37d   : > { %1565 = vmatpush3.msra.mxu1 %v934_v37  ;;  %s1731_s0 = scalar_lea.vmem %s1730_s18, 128  ;;  %p1732_p10 = scmp.lt.s32.totalorder %s2156_s23, %s1730_s18 }
 0x37e   : > { %1567 = vmatmul.mubr.msk.f32.vlgmr.msra.gmra.mrb[4].mxu1 %vm610_vm5, %v1504_v38  ;;  %1574 = vmatprep.subr.mxu1 %v1815_v0  ;;  %p1733_p12 = scmp.lt.s32.totalorder %s1731_s0, %s1725_s24 }
 0x37f   : > { %1576 = vmatprep.mubr.msk.f32.mxu1 %vm1816_vm0, %v1815_v0 }
 0x380   : > { %1189 = vperm.xlu0 %1663, %v1511_v39   ;;  %1178 = vperm.xlu1 %1664, %v1509_v40   ;;  %p1734_p1 = por %p1733_p12, %p1732_p10 }
 0x382   : > { %p1735_p2 = pnand %p1734_p1, %p1728_p4 }
 0x384   : > { %1272 = vperm.xlu1 %1664, %v1269_v41  }
 0x3ee   : > { %v1098_v44 = vpop.permute.xlu0 %1097  ;;  %v1018_v45 = vpop.permute.xlu1 %1017 }
 0x3ef   : > { %v1020_v47 = vsel %vm1019_vm7, %v1016_v42, %v1018_v45  ;;  %1575 = vmatpush3.msra.mxu1 %v1098_v44 }
 0x3f0   : > { %1570 = vmatpush3.msra.mxu0 %v1020_v47  ;;  %1577 = vmatmul.mubr.msk.f32.vlgmr.msra.gmra.mrb[6].mxu1 %vm610_vm5, %v1507_v43 }
 0x3f1   : > { %1572 = vmatmul.mubr.msk.f32.vlgmr.msra.gmra.mrb[6].mxu0 %vm610_vm5, %v1503_v46  ;;  %1579 = vmatprep.subr.mxu0 %v1815_v0 }
 0x3f2   : > { %1581 = vmatprep.mubr.msk.f32.mxu0 %vm1816_vm0, %v1815_v0  ;;  %1584 = vmatprep.subr.mxu1 %v1815_v0 }
 0x3f3   : > { %1586 = vmatprep.mubr.msk.f32.mxu1 %vm1816_vm0, %v1815_v0 }
 0x3ff   : > { %v1179_v56 = vpop.permute.xlu1 %1178  ;;  %v1190_v60 = vpop.permute.xlu0 %1189 }
 0x403   : > { %v1273_v3 = vpop.permute.xlu1 %1272 }
 0x451   : > { %v1009_v48 = vpop.f32.mrb[4].mxu1 }
 0x452   : > { %v1568_v49 = vpop.f32.mrb[5].mxu1 }
 0x4c3   : > { %v1169_v50 = vpop.f32.mrb[6].mxu1 }
 0x4c4   : > { %v1091_v51 = vpop.f32.mrb[6].mxu0  ;;  %v1578_v52 = vpop.f32.mrb[7].mxu1 }
 0x4c5   : > { %v1092_v53 = vadd.f32 %v1091_v51, %v1009_v48  ;;  %v1573_v54 = vpop.f32.mrb[7].mxu0 }
 0x4c7   : > { %v1173_v55 = vadd.f32 %v1169_v50, %v1092_v53 }
 0x4c9   : > { %v1181_v57 = vadd.f32 %v1179_v56, %v1173_v55 }
 0x4cb   : > { %v1182_v58 = vmax.f32 %v1181_v57, 0.0 }
 0x4cd   : > { %1580 = vmatpush3.msra.mxu0 %v1182_v58 }
 0x4ce   : > { %1582 = vmatmul.mubr.msk.f32.vlgmr.msra.gmra.mrb[8].mxu0 %vm610_vm5, %v1510_v59 }
 0x5a1   : > { %v1261_v61 = vpop.f32.mrb[8].mxu0 }
 0x5a2   : > { %v1262_v62 = vadd.f32 %v1261_v61, %v1190_v60  ;;  %v1583_v63 = vpop.f32.mrb[9].mxu0 }
 0x5a4   : > { %v1265_v0 = vadd.f32 %v1262_v62, %v934_v37 }
 0x5a6   : > { %1266 = vst.msk [vmem:[#allocation2 + $0x8] sm:$0xff] %vm582_vm4, %v1265_v0 }
 0x5ad   : > { %v1268_v2 = vld [vmem:[#allocation2 + $0x8] sm:$0xff] }
 0x5ae   : > { %1585 = vmatpush3.msra.mxu1 %v1268_v2 }
 0x5af   : > { %1587 = vmatmul.mubr.msk.f32.vlgmr.msra.gmra.mrb[8].mxu1 %vm610_vm5, %v1267_v1 }
 0x682   : > { %v1344_v4 = vpop.f32.mrb[8].mxu1 }
 0x683   : > { %v1345_v6 = vadd.f32 %v1344_v4, %v1273_v3  ;;  %v1588_v7 = vpop.f32.mrb[9].mxu1 }
 0x685   : > { %v1355_v8 = vmul.f32 %v1514_v5, %v1345_v6 }
 0x687   : > { %1357 = vst.msk [vmem:[%s490_s28] sm:$0xf] %vm1356_vm8, %v1355_v8 }
 0x688   : > { %1738 = shalt.err (!%p1735_p2)
}
 0x689   : > { %s1739_s25 = scalar_lea.hbm %s2154_s19, 64  ;;  %s1743_s13 = scalar_lea.hbm %s2215_s12, 128 }
 0x68a   : > { %p1740_p9 = scmp.ne.s32.totalorder %s2154_s19, %s1739_s25  ;;  %p1744_p6 = scmp.lt.u32.totalorder %s2154_s19, %s2215_s12 }
 0x68b   : > { %p1745_p13 = scmp.lt.u32.totalorder %s1743_s13, %s1739_s25  ;;  %p1747_p0 = scmp.lt.u32.totalorder %s1739_s25, %s2154_s19 }
 0x68c   : > { %p1741_p11 = pnand %p1740_p9, %p2241_p5 }
 0x68d   : > { %p1746_p8 = por %p1745_p13, %p1744_p6 }
 0x68e   : > { %p1742_p3 = pneg %p1741_p11 }
 0x68f   : > { %p1748_p7 = por %p1747_p0, %p1746_p8 }
 0x691   : > { %p1749_p4 = pnand %p1748_p7, %p1742_p3 }
 0x693   : > { %1752 = shalt.err (!%p1749_p4)
}
 0x694   : > { %1593 = dma.vmem_to_hbm [thread:$0]  (%p2241_p5), %s2156_s23, 64, %s2154_s19, %s1359_s27  }
 0x695 PF: > { %s2242_s28 = sld [smem:[#allocation12_spill]]  ;;  %s2243_s21 = sld [smem:[#allocation17_spill]] }
 0x696   : > { %p2245_p12 = scmp.ge.s32.totalorder %s1811_s26, 2 }
 0x69b   : > { %s1384_s20 = sand.u32 1, %s2242_s28   ;;  %p2244_p10 = scmp.ne.s32.totalorder %s2243_s21, 0 }
 0x69c   : > { %s1385_s24 = scalar_lea.sflag [#allocation5], %s1384_s20 }
 0x69d   : > { %p1603_p1 = pnand %p2245_p12, %p2244_p10 }
 0x69f   : > { %1786 = dma.done.wait (!%p1603_p1), %s1385_s24, 64  }
 0x6a0   : > { %1788 = vsyncadd (!%p1603_p1), %s1385_s24, 4294967232  ;;  %s31_s26 = sadd.s32 1, %s1811_s26   ;;  %s2246_s30 = sld [smem:[#allocation13_spill]] }
 0x6a1   : > { %p28_p2 = scmp.ge.s32.totalorder %s31_s26, 4   ;;  %s2247_s23 = sld [smem:[#allocation16_spill]] }
 0x6a2   : > { %s2248_s24 = sld [smem:[#allocation14_spill]]  ;;  %s2249_s25 = sld [smem:[#allocation15_spill]] }
 0x6a3   : > { %s2250_s21 = smov %s1795_s22  ;;  %30 = sbr.rel (!%p28_p2) target bundleno = 10 (0xa), region = 147 }
 0x6a6   : > { %s2251_s22 = smov %s2246_s30 }
 0x6aa   :  { %1390 = vsyncpa [#allocation4], 1 }
 0x6ab   :  { %1392 = vsyncpa [#allocation4 + $0x1], 1 }
 0x6ac   :  { %1393 = vsyncpa [#allocation7], 1 }
 0x6ad   :  { %1395 = vsyncpa [#allocation7 + $0x1], 1 }
 0x6ae   :  { %1396 = vsyncpa [#allocation5], 1 }
 0x6af   :  { %1398 = vsyncpa [#allocation5 + $0x1], 1 }

</bundles_post_ra>
